<compile_context>
chip_gen: v7x
topology: tpu7x:2x2x1
jax: 0.10.0
libtpu: 0.0.40
codegen_flags: <defaults>
</compile_context>

<pallas_src>
import jax
import jax.numpy as jnp
from jax.experimental import pallas as pl
from jax.experimental.pallas import tpu as pltpu

_C_PAD = 8  # 2 classes padded to one sublane group (zero rows are benign)


def _linear_classifier_kernel(x_ref, w_ref, b_ref, o_ref):
    # x_ref: (TB, D)   w_ref: (C_PAD, D)   b_ref: (C_PAD, 1)   o_ref: (C_PAD, TB)
    x = x_ref[...].astype(jnp.float32)

    # Logits on the raw (un-normalized) x. Normalization commutes with the
    # linear layer:  W (x * inv) + b  ==  (W x) * inv + b.
    # A.B^T form (contract dim 1 of both); the large (TB, D) operand stays put.
    # TODO(synk): per review, confirm via pl.lower_as_mlir that no XLU
    # transpose of the (TB, D) operand is materialized for very large D.
    z = jax.lax.dot_general(
        w_ref[...].astype(jnp.float32), x,
        dimension_numbers=(((1,), (1,)), ((), ())),
        preferred_element_type=jnp.float32)                    # (C_PAD, TB)

    # Per-row squared norm, produced directly lane-major as (C_PAD, TB) with
    # identical rows via a ones-block MXU contraction (otherwise-idle MXU);
    # avoids an XLU lane-reduce and a (TB,1)->(1,TB) relayout.
    ones_blk = jnp.ones(w_ref.shape, jnp.float32)               # (C_PAD, D)
    sq = jax.lax.dot_general(
        ones_blk, x * x,
        dimension_numbers=(((1,), (1,)), ((), ())),
        preferred_element_type=jnp.float32)                     # (C_PAD, TB)

    # F.normalize: x / max(||x||, 1e-12)  ==  x * rsqrt(max(||x||^2, 1e-24)).
    inv = jax.lax.rsqrt(jnp.maximum(sq, 1e-24))                 # EUP rsqrt
    o_ref[...] = (z * inv + b_ref[...].astype(jnp.float32)).astype(o_ref.dtype)


def prepare_classifier_params(weight, bias):
    """Pad (n_out, D) weight / (n_out,) bias once, outside the hot path."""
    n_out, d = weight.shape
    w_pad = jnp.zeros((_C_PAD, d), jnp.float32).at[:n_out, :].set(
        weight.astype(jnp.float32))
    b_pad = jnp.zeros((_C_PAD, 1), jnp.float32).at[:n_out, 0].set(
        bias.astype(jnp.float32))
    return w_pad, b_pad


def _round_up(n, m):
    return ((n + m - 1) // m) * m


def _vmem_budget_bytes():
    """Usable scoped-VMEM budget: physical capacity minus compiler headroom."""
    cap = None
    try:
        cap = getattr(pltpu.get_tpu_info(), "vmem_capacity_bytes", None)
    except Exception:  # pragma: no cover - info query unavailable
        cap = None
    if not cap:
        cap = 64 << 20  # conservative default: v7x physical per-TC VMEM
    # Leave ~16 MiB for the compiler; never budget beyond 96 MiB (v5e/v6e).
    return int(max(16 << 20, min(int(cap) - (16 << 20), 96 << 20)))


def _vmem_need_bytes(tb, d_lanes):
    """Lane-padded estimate of what Mosaic actually allocates for one config."""
    x_tile = tb * d_lanes * 4                          # f32 x tile (lane padded)
    o_tile = _C_PAD * _round_up(tb, 128) * 4           # f32 output tile
    resident = 2 * (_C_PAD * d_lanes * 4 + _C_PAD * 128 * 4)   # W + b (2 bufs)
    temps = 2 * x_tile + 2 * o_tile                    # x*x, z, inv temporaries
    return 2 * (x_tile + o_tile) + resident + temps + (2 << 20)


def _choose_tile(B, D, vmem_budget, *, target_step_bytes=2 << 20):
    """Batch tile sized from a bytes-per-step target, capped by VMEM."""
    d_lanes = _round_up(max(D, 1), 128)
    row_bytes = d_lanes * 4
    tb = max(8, (target_step_bytes // row_bytes) // 8 * 8)
    tb = min(tb, 4096)
    tb = min(tb, _round_up(B, 8))
    # Shrink the tile until double-buffered tiles + temporaries fit VMEM
    # (never clamp the limit below the real requirement).
    while tb > 8 and _vmem_need_bytes(tb, d_lanes) > vmem_budget:
        tb = max(8, _round_up(tb // 2, 8))
    # For large batches, guarantee >=2 blocks so the "parallel" batch axis can
    # shard across v7x's two TensorCores (neutral on v5e/v6e).
    if B >= 512 and pl.cdiv(B, tb) == 1:
        tb = max(8, _round_up((B + 1) // 2, 8))
    return tb, d_lanes


def linear_classifier_forward(x, w_pad, b_pad, n_out=2, *,
                              use_pallas=None, class_major=False):
    """x: (B, D) float; w_pad: (8, D); b_pad: (8, 1). Returns (B, n_out)
    (or (n_out, B) if class_major=True, avoiding the trailing transpose)."""
    B, D = x.shape

    # Tiny-input fast path: kernel launch + pipeline prologue exceed the whole
    # computation for toy sizes; XLA fuses the 3-op graph for free.
    if use_pallas is None:
        use_pallas = (B * D * x.dtype.itemsize) >= (256 << 10)
    if not use_pallas:
        xf = x.astype(jnp.float32)
        inv = jax.lax.rsqrt(
            jnp.maximum(jnp.sum(xf * xf, axis=-1, keepdims=True), 1e-24))
        y = (xf * inv) @ w_pad[:n_out].T + b_pad[:n_out, 0]
        return y.T if class_major else y

    vmem_budget = _vmem_budget_bytes()
    tb, d_lanes = _choose_tile(B, D, vmem_budget)
    num_blocks = pl.cdiv(B, tb)
    bp = num_blocks * tb
    vmem_limit = int(min(vmem_budget,
                         max(4 << 20, _vmem_need_bytes(tb, d_lanes))))

    # NOTE: no wrapper-side pad of x. A ragged last block reads unspecified
    # rows, but each garbage row only affects its own output COLUMN (column t
    # of o depends only on row t of x); those columns are sliced off below.
    # Do not consume the full (C_PAD, bp) buffer anywhere else.
    out = pl.pallas_call(
        _linear_classifier_kernel,
        out_shape=jax.ShapeDtypeStruct((_C_PAD, bp), jnp.float32),
        grid_spec=pltpu.PrefetchScalarGridSpec(
            num_scalar_prefetch=0,
            grid=(num_blocks,),
            in_specs=[
                pl.BlockSpec((tb, D), lambda i: (i, 0)),        # x tile
                pl.BlockSpec((_C_PAD, D), lambda i: (0, 0)),    # resident W
                pl.BlockSpec((_C_PAD, 1), lambda i: (0, 0)),    # resident bias
            ],
            out_specs=pl.BlockSpec((_C_PAD, tb), lambda i: (0, i)),
        ),
        compiler_params=pltpu.CompilerParams(
            dimension_semantics=("parallel",),   # batch blocks shard across TCs
            vmem_limit_bytes=vmem_limit),
    )(x, w_pad, b_pad)

    logits = out[:n_out, :B]                     # contiguous lane-dense slice
    return logits if class_major else logits.T


if __name__ == "__main__":
    N_CLASSES = 2
    key = jax.random.PRNGKey(0)

    def make_case(case_key, B, D):
        kx, kw, kb = jax.random.split(case_key, 3)
        x = jax.random.normal(kx, (B, D), dtype=jnp.float32)
        # Deterministic init mimicking nn.Linear default (uniform +- 1/sqrt(D)).
        bound = 1.0 / jnp.sqrt(jnp.float32(D))
        weight = jax.random.uniform(kw, (N_CLASSES, D), jnp.float32,
                                    minval=-bound, maxval=bound)
        bias = jax.random.uniform(kb, (N_CLASSES,), jnp.float32,
                                  minval=-bound, maxval=bound)
        return x, weight, bias

    def reference(x, weight, bias):
        xn = x / jnp.maximum(
            jnp.sqrt(jnp.sum(x * x, axis=-1, keepdims=True)), 1e-12)
        return jnp.dot(xn, weight.T,
                       precision=jax.lax.Precision.HIGHEST) + bias

    # TODO(synk): torch.optim.SGD / .cuda() in __init__ are training/device
    # setup, not part of the forward pass, and are not translated.

    k1, k2 = jax.random.split(key)

    # Case 1: module-sized toy shape (config['out_feature_dim'] = 32), forced
    # through the Pallas kernel to exercise it at small shapes.
    x, w, b = make_case(k1, 8, 32)
    w_pad, b_pad = prepare_classifier_params(w, b)      # hoisted, static
    y = jax.block_until_ready(
        linear_classifier_forward(x, w_pad, b_pad, N_CLASSES, use_pallas=True))
    assert y.shape == (8, N_CLASSES)
    assert jnp.allclose(y, reference(x, w, b), atol=1e-5, rtol=1e-5)

    # Same toy shape through the auto-routed tiny-input fast path.
    y_fast = jax.block_until_ready(
        linear_classifier_forward(x, w_pad, b_pad, N_CLASSES))
    assert jnp.allclose(y_fast, reference(x, w, b), atol=1e-5, rtol=1e-5)

    # Case 2: larger batch exercising the multi-block Pallas path
    # (>=2 "parallel" grid blocks -> both TensorCores on v7x).
    xb, wb, bb = make_case(k2, 2048, 256)
    wb_pad, bb_pad = prepare_classifier_params(wb, bb)
    yb = jax.block_until_ready(
        linear_classifier_forward(xb, wb_pad, bb_pad, N_CLASSES))
    assert yb.shape == (2048, N_CLASSES)
    assert jnp.allclose(yb, reference(xb, wb, bb), atol=1e-4, rtol=1e-4)

    print("KERNEL_OK")
</pallas_src>

<mosaic_0001>
module attributes {stable_mosaic.version = 11 : i64} {
  func.func @_linear_classifier_kernel(%arg0: i32, %arg1: memref<8x32xf32, #tpu.memory_space<vmem>>, %arg2: memref<8x32xf32, #tpu.memory_space<vmem>>, %arg3: memref<8x1xf32, #tpu.memory_space<vmem>>, %arg4: memref<8x8xf32, #tpu.memory_space<vmem>>) attributes {dimension_semantics = [#tpu.dimension_semantics<parallel>], iteration_bounds = array<i64: 1>, scalar_prefetch = 0 : i64, scratch_operands = 0 : i64, tpu.core_type = #tpu.core_type<tc>, window_params = [{transform_indices = @transform_0, window_bounds = array<i64: 8, 32>}, {pipeline_mode = #tpu.pipeline_mode<synchronous>, transform_indices = @transform_1, window_bounds = array<i64: 8, 32>}, {pipeline_mode = #tpu.pipeline_mode<synchronous>, transform_indices = @transform_2, window_bounds = array<i64: 8, 1>}, {transform_indices = @transform_3, window_bounds = array<i64: 8, 8>}]} {
    %c0 = arith.constant 0 : index
    %c0_0 = arith.constant 0 : index
    %0 = vector.load %arg1[%c0, %c0_0] : memref<8x32xf32, #tpu.memory_space<vmem>>, vector<8x32xf32>
    %c0_1 = arith.constant 0 : index
    %c0_2 = arith.constant 0 : index
    %1 = vector.load %arg2[%c0_1, %c0_2] : memref<8x32xf32, #tpu.memory_space<vmem>>, vector<8x32xf32>
    %cst = arith.constant dense<0.000000e+00> : vector<8x8xf32>
    %2 = tpu.matmul %1, %0, %cst {dimension_numbers = #tpu.dot_dimension_numbers<[1], [1], [0], [0], [0, 0, 1, 0], [], []>} : vector<8x32xf32>, vector<8x32xf32>, vector<8x8xf32> -> vector<8x8xf32>
    %cst_3 = arith.constant 1.000000e+00 : f32
    %3 = vector.broadcast %cst_3 : f32 to vector<8x32xf32>
    %4 = arith.mulf %0, %0 : vector<8x32xf32>
    %cst_4 = arith.constant dense<0.000000e+00> : vector<8x8xf32>
    %5 = tpu.matmul %3, %4, %cst_4 {dimension_numbers = #tpu.dot_dimension_numbers<[1], [1], [0], [0], [0, 0, 1, 0], [], []>} : vector<8x32xf32>, vector<8x32xf32>, vector<8x8xf32> -> vector<8x8xf32>
    %cst_5 = arith.constant 1.000000e-24 : f32
    %6 = vector.broadcast %cst_5 : f32 to vector<8x8xf32>
    %7 = arith.maximumf %5, %6 : vector<8x8xf32>
    %8 = math.rsqrt %7 : vector<8x8xf32>
    %9 = arith.mulf %2, %8 : vector<8x8xf32>
    %c0_6 = arith.constant 0 : index
    %c0_7 = arith.constant 0 : index
    %10 = vector.load %arg3[%c0_6, %c0_7] : memref<8x1xf32, #tpu.memory_space<vmem>>, vector<8x1xf32>
    %11 = vector.broadcast %10 : vector<8x1xf32> to vector<8x8xf32>
    %12 = arith.addf %9, %11 : vector<8x8xf32>
    %c0_8 = arith.constant 0 : index
    %c0_9 = arith.constant 0 : index
    %13 = vector.load %arg4[%c0_8, %c0_9] : memref<8x8xf32, #tpu.memory_space<vmem>>, vector<8x8xf32>
    tpu.vector_store %arg4[%c0_8, %c0_9], %12 {strides = array<i32>} : memref<8x8xf32, #tpu.memory_space<vmem>>, vector<8x8xf32>,
    return
  }
  func.func @transform_0(%arg0: i32) -> (i32, i32) {
    %c0_i32 = arith.constant 0 : i32
    %c0_i32_0 = arith.constant 0 : i32
    return %arg0, %c0_i32 : i32, i32
  }
  func.func @transform_1(%arg0: i32) -> (i32, i32) {
    %c0_i32 = arith.constant 0 : i32
    %c0_i32_0 = arith.constant 0 : i32
    %c0_i32_1 = arith.constant 0 : i32
    return %c0_i32, %c0_i32_0 : i32, i32
  }
  func.func @transform_2(%arg0: i32) -> (i32, i32) {
    %c0_i32 = arith.constant 0 : i32
    %c0_i32_0 = arith.constant 0 : i32
    %c0_i32_1 = arith.constant 0 : i32
    return %c0_i32, %c0_i32_0 : i32, i32
  }
  func.func @transform_3(%arg0: i32) -> (i32, i32) {
    %c0_i32 = arith.constant 0 : i32
    %c0_i32_0 = arith.constant 0 : i32
    return %c0_i32, %arg0 : i32, i32
  }
}

</mosaic_0001>

<bundles_post_ra>
// kernel: tpu_custom_call.1
= control target key start
LH: loop header
LB: loop body
LE: loop exit
PB: predicated region body
PF: predicated region fallthrough
CT: control target
= control target key end

     0   :  { %8 = vsyncpa [#allocation3], 0  ;;  %s341_s0 = inlined_call_operand.vmem [shape: f32[8,32], index: 0, kind: input, shape index: {}]   ;;  %s342_s1 = inlined_call_operand.hbm [shape: f32[8,32], index: 1, kind: input, shape index: {}]   ;;  %s343_s2 = inlined_call_operand.vmem [shape: f32[8,1], index: 2, kind: input, shape index: {}]   ;;  %s344_s3 = inlined_call_operand.hbm [shape: f32[8,8], index: 3, kind: output, shape index: {}]  }
   0x1   :  { %9 = vsyncpa [#allocation4], 0  ;;  %s285_s12 = smov [#allocation2]   ;;  %s237_s16 = scalar_lea.hbm %s342_s1, 128 }
   0x2   :  { %s18_s13 = sshll.u32 %s285_s12, 4  ;;  %p238_p0 = scmp.ne.s32.totalorder %s342_s1, %s237_s16  ;;  %s19_s13 = int_to_ptr.vmem [resolvable:$true] %s18_s13 }
   0x3   :  { %p241_p1 = scmp.lt.u32.totalorder %s237_s16, %s342_s1 }
   0x5   :  { %p243_p2 = pnand %p241_p1, %p238_p0 }
   0x7   :  { %246 = shalt.err (!%p243_p2)
}
   0x8   :  { %s247_s21 = scalar_lea.vmem %s19_s13, 128  ;;  %p252_p4 = scmp.lt.s32.totalorder %s19_s13, %s19_s13 }
   0x9   :  { %p248_p3 = scmp.ne.s32.totalorder %s19_s13, %s247_s21  ;;  %p253_p5 = scmp.lt.s32.totalorder %s247_s21, %s247_s21 }
   0xb   :  { %p254_p6 = por %p253_p5, %p252_p4 }
   0xd   :  { %p255_p7 = pnand %p254_p6, %p248_p3 }
   0xf   :  { %258 = shalt.err (!%p255_p7)
}
  0x10   :  { %21 = dma.hbm_to_vmem [thread:$0]  %s342_s1, 128, %s19_s13, [#allocation3]  }
  0x11   :  { %281 = dma.done.wait [#allocation3], 128  }
  0x12   :  { %282 = vsyncadd [#allocation3], 4294967168  ;;  %v286_v0 = vmov 0.0   ;;  %vm287_vm0 = vmmov 0   ;;  %v288_v1 = vmov 0   ;;  %v27_v2 = vld [vmem:[%s341_s0] sm:$0xff] }
  0x13   :  { %223 = vmatprep.subr.mxu1 %v286_v0  ;;  %225 = vmatprep.mubr.msk.f32.mxu1 %vm287_vm0, %v286_v0  ;;  %vm29_vm1 = vcmask 261120   ;;  %v186_v3 = vld [vmem:[%s343_s2] sm:$0xff]  ;;  %v106_v4 = vmul.f32 %v27_v2, %v27_v2  ;;  %v289_v6 = vmov 1.0   ;;  %s290_s0 = smov [#allocation5]   ;;  %vm193_vm2 = vcmask 64512  }
  0x14   :  { %218 = vmatprep.subr.mxu0 %v286_v0  ;;  %220 = vmatprep.mubr.msk.f32.mxu0 %vm287_vm0, %v286_v0  ;;  %v28_v5 = vld [vmem:[#allocation2] sm:$0xff]  ;;  %s201_s1 = sshll.u32 %s290_s0, 4  ;;  %s202_s1 = int_to_ptr.vmem [resolvable:$true] %s201_s1 }
  0x15   :  { %234 = vset.pattern.permute.xlu0 %v288_v1  ;;  %219 = vmatpush3.xpose.msk.msra.mxu0 %vm29_vm1, %v27_v2  ;;  %s259_s2 = scalar_lea.vmem %s202_s1, 128  ;;  %p264_p9 = scmp.lt.s32.totalorder %s202_s1, %s202_s1 }
  0x16   :  { %189 = vperm.xlu0 %234, %v186_v3   ;;  %224 = vmatpush3.xpose.msk.msra.mxu1 %vm29_vm1, %v106_v4  ;;  %p260_p8 = scmp.ne.s32.totalorder %s202_s1, %s259_s2  ;;  %p265_p10 = scmp.lt.s32.totalorder %s259_s2, %s259_s2 }
  0x18   :  { %221 = vmatmul.mubr.msk.f32.vlgmr.msra.gmra.mrb[0].mxu0 %vm29_vm1, %v28_v5  ;;  %p266_p11 = por %p265_p10, %p264_p9 }
  0x19   :  { %226 = vmatmul.mubr.msk.f32.vlgmr.msra.gmra.mrb[0].mxu1 %vm29_vm1, %v289_v6 }
  0x1a   :  { %p267_p12 = pnand %p266_p11, %p260_p8 }
  0x95   :  { %v190_v13 = vpop.permute.xlu0 %189 }
  0xeb   :  { %v102_v7 = vpop.f32.mrb[0].mxu0 }
  0xec   :  { %v222_v8 = vpop.f32.mrb[1].mxu0  ;;  %v179_v9 = vpop.f32.mrb[0].mxu1 }
  0xed   :  { %v183_v10 = vmax.f32 %v179_v9, 1e-24  ;;  %v227_v11 = vpop.f32.mrb[1].mxu1 }
  0xef   :  { %235 = vrsqrt.f32 %v183_v10 }
  0xf9   :  { %v236_v12 = vpop.eup %235 }
  0xfa   :  { %v185_v14 = vmul.f32 %v236_v12, %v102_v7 }
  0xfc   :  { %v192_v15 = vadd.f32 %v190_v13, %v185_v14 }
  0xfe   :  { %194 = vst.msk [vmem:[#allocation5] sm:$0xff] %vm193_vm2, %v192_v15 }
  0xff   :  { %270 = shalt.err (!%p267_p12)
}
 0x100   :  { %s271_s30 = scalar_lea.hbm %s344_s3, 128 }
 0x101   :  { %p272_p13 = scmp.ne.s32.totalorder %s344_s3, %s271_s30  ;;  %p275_p0 = scmp.lt.u32.totalorder %s271_s30, %s344_s3 }
 0x103   :  { %p277_p1 = pnand %p275_p0, %p272_p13 }
 0x105   :  { %280 = shalt.err (!%p277_p1)
}
 0x106   :  { %204 = dma.vmem_to_hbm [thread:$0]  %s202_s1, 128, %s344_s3, [#allocation4]  }
 0x107   :  { %283 = dma.done.wait [#allocation4], 128  }
 0x108   :  { %284 = vsyncadd [#allocation4], 4294967168 }
 0x109   :  { %208 = vsyncpa [#allocation3], 1 }
 0x10a   :  { %209 = vsyncpa [#allocation4], 1 }

</bundles_post_ra>
